<compile_context>
chip_gen: v6e
topology: v6e:2x2x1
jax: 0.10.0
libtpu: 0.0.40
codegen_flags: <defaults>
</compile_context>

<pallas_src>
import jax
import jax.numpy as jnp
from jax.experimental import pallas as pl
from jax.experimental.pallas import tpu as pltpu

# Logical (PyTorch) dims and padded, lane/MXU-aligned hidden dims.
D_IN, H0, H1, H2, D_OUT = 28 * 28, 200, 100, 50, 10
H0_P, H1_P, H2_P, HOUT_P = 256, 128, 128, 128


def _round_up(n, m):
    return ((n + m - 1) // m) * m


def mlp_kernel(x_ref,
               w0_ref, b0_ref,
               w1_ref, b1_ref,
               w2_ref, b2_ref,
               w3_ref, b3_ref,
               o_ref):
    # One batch tile: 4 matmuls + 3 ReLUs fused; intermediates never touch HBM.
    cdt = w0_ref.dtype  # MXU operand dtype (bf16 by default, f32 for validation)

    x = x_ref[...].astype(cdt)

    h = jnp.dot(x, w0_ref[...], preferred_element_type=jnp.float32) + b0_ref[...]
    h = jnp.maximum(h, 0.0)                                   # relu0 (f32)

    h = jnp.dot(h.astype(cdt), w1_ref[...],
                preferred_element_type=jnp.float32) + b1_ref[...]
    h = jnp.maximum(h, 0.0)                                   # relu1 (f32)

    h = jnp.dot(h.astype(cdt), w2_ref[...],
                preferred_element_type=jnp.float32) + b2_ref[...]
    h = jnp.maximum(h, 0.0)                                   # relu2 (f32)

    out = jnp.dot(h.astype(cdt), w3_ref[...],
                  preferred_element_type=jnp.float32) + b3_ref[...]
    # Store only the 10 logical output columns (narrow, masked store).
    o_ref[...] = out[:, :o_ref.shape[1]].astype(o_ref.dtype)


def _pad_params(params, compute_dtype):
    """Zero-pad weights/biases to lane-aligned shapes.

    Weights are cast to compute_dtype (MXU operands); biases stay f32.
    Zero-padded columns stay zero through bias-add and ReLU, so the math is
    unchanged.  The input contraction dim (784) is left unpadded.
    """
    dims = [(D_IN, H0, D_IN, H0_P),
            (H0, H1, H0_P, H1_P),
            (H1, H2, H1_P, H2_P),
            (H2, D_OUT, H2_P, HOUT_P)]
    out = []
    for (w, b), (k, n, kp, np_) in zip(params, dims):
        wp = jnp.zeros((kp, np_), jnp.float32).at[:k, :n].set(w).astype(compute_dtype)
        bp = jnp.zeros((1, np_), jnp.float32).at[:, :n].set(b.reshape(1, -1))
        out.append((wp, bp))
    return out


def mlp_forward(x, params, *, tm=1024, compute_dtype=jnp.bfloat16):
    """x: (B, 784); params: list of 4 (W, b) with W: (in, out), b: (1, out).

    compute_dtype: dtype of the MXU operands (weights + per-dot activation
    cast inside the kernel).  Accumulation / bias / ReLU are always f32.
    """
    B, d_in = x.shape
    assert d_in == D_IN

    # Batch tile: multiple of 8 (sublane), capped at tm.  When B is large
    # enough, force >= 2 grid steps so v7x's two TensorCores both get work.
    TM = min(tm, _round_up(max(B, 8), 8))
    if B >= 16 and TM >= B:
        TM = _round_up((B + 1) // 2, 8)
    num_tiles = pl.cdiv(B, TM)          # partial last tile handled by Pallas

    pparams = _pad_params(params, compute_dtype)
    (w0, b0), (w1, b1), (w2, b2), (w3, b3) = pparams

    # Weights / biases: whole array resident, same block for every grid step
    # (constant index_map => fetched once, kept in VMEM across the grid).
    def resident(a):
        return pl.BlockSpec(a.shape, lambda i: (0, 0))

    in_specs = [pl.BlockSpec((TM, D_IN), lambda i: (i, 0)),   # x streamed, natural width
                resident(w0), resident(b0),
                resident(w1), resident(b1),
                resident(w2), resident(b2),
                resident(w3), resident(b3)]
    out_spec = pl.BlockSpec((TM, D_OUT), lambda i: (i, 0))    # narrow (B,10) output

    w_itemsize = jnp.dtype(compute_dtype).itemsize
    weight_bytes = sum(int(w.size) * w_itemsize + int(b.size) * 4
                       for (w, b) in pparams)
    flops = 2 * B * (D_IN * H0_P + H0_P * H1_P + H1_P * H2_P + H2_P * HOUT_P)
    bytes_accessed = (B * D_IN * jnp.dtype(x.dtype).itemsize
                      + B * D_OUT * 4 + weight_bytes)
    cost = pl.CostEstimate(flops=flops, transcendentals=0,
                           bytes_accessed=int(bytes_accessed))

    return pl.pallas_call(
        mlp_kernel,
        out_shape=jax.ShapeDtypeStruct((B, D_OUT), jnp.float32),
        grid=(num_tiles,),
        in_specs=in_specs,
        out_specs=out_spec,
        compiler_params=pltpu.CompilerParams(
            dimension_semantics=("parallel",)),
        cost_estimate=cost,
    )(x, w0, b0, w1, b1, w2, b2, w3, b3)


def init_params(key):
    """Deterministic init matching nn.Linear's shapes (Kaiming-uniform-like)."""
    dims = [(D_IN, H0), (H0, H1), (H1, H2), (H2, D_OUT)]
    params = []
    for (fan_in, fan_out) in dims:
        key, kw, kb = jax.random.split(key, 3)
        bound = 1.0 / jnp.sqrt(fan_in)
        W = jax.random.uniform(kw, (fan_in, fan_out), jnp.float32, -bound, bound)
        b = jax.random.uniform(kb, (1, fan_out), jnp.float32, -bound, bound)
        params.append((W, b))
    return params


def reference_forward(x, params):
    h = x
    for i, (W, b) in enumerate(params):
        if i > 0:
            h = jnp.maximum(h, 0.0)
        h = h @ W + b
    return h


if __name__ == "__main__":
    key = jax.random.PRNGKey(0)
    kx, kp = jax.random.split(key)

    B = 8  # small batch for the self-test; kernel tiles up to TM=1024 at large B
    x = jax.random.normal(kx, (B, D_IN), dtype=jnp.float32)
    params = init_params(kp)
    ref = reference_forward(x, params)

    # f32-operand validation path: tight tolerance.
    out_f32 = jax.block_until_ready(
        mlp_forward(x, params, compute_dtype=jnp.float32))
    assert out_f32.shape == (B, D_OUT)
    assert jnp.allclose(out_f32, ref, atol=1e-4, rtol=1e-4), "f32 mismatch vs reference"

    # Default bf16-operand (performance) path: looser tolerance (bf16 operand
    # rounding, f32 accumulation).
    out_bf16 = jax.block_until_ready(mlp_forward(x, params))
    assert out_bf16.shape == (B, D_OUT)
    assert jnp.allclose(out_bf16, ref, atol=3e-2, rtol=3e-2), "bf16 mismatch vs reference"

    print("KERNEL_OK")
</pallas_src>

<mosaic_0001>
module attributes {stable_mosaic.version = 11 : i64} {
  func.func @mlp_kernel(%arg0: i32, %arg1: memref<8x784xf32, #tpu.memory_space<vmem>>, %arg2: memref<784x256xf32, #tpu.memory_space<vmem>>, %arg3: memref<1x256xf32, #tpu.memory_space<vmem>>, %arg4: memref<256x128xf32, #tpu.memory_space<vmem>>, %arg5: memref<1x128xf32, #tpu.memory_space<vmem>>, %arg6: memref<128x128xf32, #tpu.memory_space<vmem>>, %arg7: memref<1x128xf32, #tpu.memory_space<vmem>>, %arg8: memref<128x128xf32, #tpu.memory_space<vmem>>, %arg9: memref<1x128xf32, #tpu.memory_space<vmem>>, %arg10: memref<8x10xf32, #tpu.memory_space<vmem>>) attributes {dimension_semantics = [#tpu.dimension_semantics<parallel>], iteration_bounds = array<i64: 1>, scalar_prefetch = 0 : i64, scratch_operands = 0 : i64, tpu.core_type = #tpu.core_type<tc>, window_params = [{transform_indices = @transform_0, window_bounds = array<i64: 8, 784>}, {pipeline_mode = #tpu.pipeline_mode<synchronous>, transform_indices = @transform_1, window_bounds = array<i64: 784, 256>}, {pipeline_mode = #tpu.pipeline_mode<synchronous>, transform_indices = @transform_2, window_bounds = array<i64: 1, 256>}, {pipeline_mode = #tpu.pipeline_mode<synchronous>, transform_indices = @transform_3, window_bounds = array<i64: 256, 128>}, {pipeline_mode = #tpu.pipeline_mode<synchronous>, transform_indices = @transform_4, window_bounds = array<i64: 1, 128>}, {pipeline_mode = #tpu.pipeline_mode<synchronous>, transform_indices = @transform_5, window_bounds = array<i64: 128, 128>}, {pipeline_mode = #tpu.pipeline_mode<synchronous>, transform_indices = @transform_6, window_bounds = array<i64: 1, 128>}, {pipeline_mode = #tpu.pipeline_mode<synchronous>, transform_indices = @transform_7, window_bounds = array<i64: 128, 128>}, {pipeline_mode = #tpu.pipeline_mode<synchronous>, transform_indices = @transform_8, window_bounds = array<i64: 1, 128>}, {transform_indices = @transform_9, window_bounds = array<i64: 8, 10>}]} {
    %c0 = arith.constant 0 : index
    %c0_0 = arith.constant 0 : index
    %0 = vector.load %arg1[%c0, %c0_0] : memref<8x784xf32, #tpu.memory_space<vmem>>, vector<8x784xf32>
    %c0_1 = arith.constant 0 : index
    %c0_2 = arith.constant 0 : index
    %1 = vector.load %arg2[%c0_1, %c0_2] : memref<784x256xf32, #tpu.memory_space<vmem>>, vector<784x256xf32>
    %cst = arith.constant dense<0.000000e+00> : vector<8x256xf32>
    %2 = tpu.matmul %0, %1, %cst {dimension_numbers = #tpu.dot_dimension_numbers<[1], [0], [0], [1], [0, 0, 1, 1], [], []>} : vector<8x784xf32>, vector<784x256xf32>, vector<8x256xf32> -> vector<8x256xf32>
    %c0_3 = arith.constant 0 : index
    %c0_4 = arith.constant 0 : index
    %3 = vector.load %arg3[%c0_3, %c0_4] : memref<1x256xf32, #tpu.memory_space<vmem>>, vector<1x256xf32>
    %4 = vector.broadcast %3 : vector<1x256xf32> to vector<8x256xf32>
    %5 = arith.addf %2, %4 : vector<8x256xf32>
    %cst_5 = arith.constant 0.000000e+00 : f32
    %6 = vector.broadcast %cst_5 : f32 to vector<8x256xf32>
    %7 = arith.maximumf %5, %6 : vector<8x256xf32>
    %c0_6 = arith.constant 0 : index
    %c0_7 = arith.constant 0 : index
    %8 = vector.load %arg4[%c0_6, %c0_7] : memref<256x128xf32, #tpu.memory_space<vmem>>, vector<256x128xf32>
    %cst_8 = arith.constant dense<0.000000e+00> : vector<8x128xf32>
    %9 = tpu.matmul %7, %8, %cst_8 {dimension_numbers = #tpu.dot_dimension_numbers<[1], [0], [0], [1], [0, 0, 1, 1], [], []>} : vector<8x256xf32>, vector<256x128xf32>, vector<8x128xf32> -> vector<8x128xf32>
    %c0_9 = arith.constant 0 : index
    %c0_10 = arith.constant 0 : index
    %10 = vector.load %arg5[%c0_9, %c0_10] : memref<1x128xf32, #tpu.memory_space<vmem>>, vector<1x128xf32>
    %11 = vector.broadcast %10 : vector<1x128xf32> to vector<8x128xf32>
    %12 = arith.addf %9, %11 : vector<8x128xf32>
    %cst_11 = arith.constant 0.000000e+00 : f32
    %13 = vector.broadcast %cst_11 : f32 to vector<8x128xf32>
    %14 = arith.maximumf %12, %13 : vector<8x128xf32>
    %c0_12 = arith.constant 0 : index
    %c0_13 = arith.constant 0 : index
    %15 = vector.load %arg6[%c0_12, %c0_13] : memref<128x128xf32, #tpu.memory_space<vmem>>, vector<128x128xf32>
    %cst_14 = arith.constant dense<0.000000e+00> : vector<8x128xf32>
    %16 = tpu.matmul %14, %15, %cst_14 {dimension_numbers = #tpu.dot_dimension_numbers<[1], [0], [0], [1], [0, 0, 1, 1], [], []>} : vector<8x128xf32>, vector<128x128xf32>, vector<8x128xf32> -> vector<8x128xf32>
    %c0_15 = arith.constant 0 : index
    %c0_16 = arith.constant 0 : index
    %17 = vector.load %arg7[%c0_15, %c0_16] : memref<1x128xf32, #tpu.memory_space<vmem>>, vector<1x128xf32>
    %18 = vector.broadcast %17 : vector<1x128xf32> to vector<8x128xf32>
    %19 = arith.addf %16, %18 : vector<8x128xf32>
    %cst_17 = arith.constant 0.000000e+00 : f32
    %20 = vector.broadcast %cst_17 : f32 to vector<8x128xf32>
    %21 = arith.maximumf %19, %20 : vector<8x128xf32>
    %c0_18 = arith.constant 0 : index
    %c0_19 = arith.constant 0 : index
    %22 = vector.load %arg8[%c0_18, %c0_19] : memref<128x128xf32, #tpu.memory_space<vmem>>, vector<128x128xf32>
    %cst_20 = arith.constant dense<0.000000e+00> : vector<8x128xf32>
    %23 = tpu.matmul %21, %22, %cst_20 {dimension_numbers = #tpu.dot_dimension_numbers<[1], [0], [0], [1], [0, 0, 1, 1], [], []>} : vector<8x128xf32>, vector<128x128xf32>, vector<8x128xf32> -> vector<8x128xf32>
    %c0_21 = arith.constant 0 : index
    %c0_22 = arith.constant 0 : index
    %24 = vector.load %arg9[%c0_21, %c0_22] : memref<1x128xf32, #tpu.memory_space<vmem>>, vector<1x128xf32>
    %25 = vector.broadcast %24 : vector<1x128xf32> to vector<8x128xf32>
    %26 = arith.addf %23, %25 : vector<8x128xf32>
    %27 = vector.extract_strided_slice %26 {offsets = [0, 0], sizes = [8, 10], strides = [1, 1]} : vector<8x128xf32> to vector<8x10xf32>
    %c0_23 = arith.constant 0 : index
    %c0_24 = arith.constant 0 : index
    %28 = vector.load %arg10[%c0_23, %c0_24] : memref<8x10xf32, #tpu.memory_space<vmem>>, vector<8x10xf32>
    tpu.vector_store %arg10[%c0_23, %c0_24], %27 {strides = array<i32>} : memref<8x10xf32, #tpu.memory_space<vmem>>, vector<8x10xf32>,
    return
  }
  func.func @transform_0(%arg0: i32) -> (i32, i32) {
    %c0_i32 = arith.constant 0 : i32
    %c0_i32_0 = arith.constant 0 : i32
    return %arg0, %c0_i32 : i32, i32
  }
  func.func @transform_1(%arg0: i32) -> (i32, i32) {
    %c0_i32 = arith.constant 0 : i32
    %c0_i32_0 = arith.constant 0 : i32
    %c0_i32_1 = arith.constant 0 : i32
    return %c0_i32, %c0_i32_0 : i32, i32
  }
  func.func @transform_2(%arg0: i32) -> (i32, i32) {
    %c0_i32 = arith.constant 0 : i32
    %c0_i32_0 = arith.constant 0 : i32
    %c0_i32_1 = arith.constant 0 : i32
    return %c0_i32, %c0_i32_0 : i32, i32
  }
  func.func @transform_3(%arg0: i32) -> (i32, i32) {
    %c0_i32 = arith.constant 0 : i32
    %c0_i32_0 = arith.constant 0 : i32
    %c0_i32_1 = arith.constant 0 : i32
    return %c0_i32, %c0_i32_0 : i32, i32
  }
  func.func @transform_4(%arg0: i32) -> (i32, i32) {
    %c0_i32 = arith.constant 0 : i32
    %c0_i32_0 = arith.constant 0 : i32
    %c0_i32_1 = arith.constant 0 : i32
    return %c0_i32, %c0_i32_0 : i32, i32
  }
  func.func @transform_5(%arg0: i32) -> (i32, i32) {
    %c0_i32 = arith.constant 0 : i32
    %c0_i32_0 = arith.constant 0 : i32
    %c0_i32_1 = arith.constant 0 : i32
    return %c0_i32, %c0_i32_0 : i32, i32
  }
  func.func @transform_6(%arg0: i32) -> (i32, i32) {
    %c0_i32 = arith.constant 0 : i32
    %c0_i32_0 = arith.constant 0 : i32
    %c0_i32_1 = arith.constant 0 : i32
    return %c0_i32, %c0_i32_0 : i32, i32
  }
  func.func @transform_7(%arg0: i32) -> (i32, i32) {
    %c0_i32 = arith.constant 0 : i32
    %c0_i32_0 = arith.constant 0 : i32
    %c0_i32_1 = arith.constant 0 : i32
    return %c0_i32, %c0_i32_0 : i32, i32
  }
  func.func @transform_8(%arg0: i32) -> (i32, i32) {
    %c0_i32 = arith.constant 0 : i32
    %c0_i32_0 = arith.constant 0 : i32
    %c0_i32_1 = arith.constant 0 : i32
    return %c0_i32, %c0_i32_0 : i32, i32
  }
  func.func @transform_9(%arg0: i32) -> (i32, i32) {
    %c0_i32 = arith.constant 0 : i32
    %c0_i32_0 = arith.constant 0 : i32
    return %arg0, %c0_i32 : i32, i32
  }
}

</mosaic_0001>

<bundles_post_ra>
// kernel: tpu_custom_call.1
= control target key start
LH: loop header
LB: loop body
LE: loop exit
PB: predicated region body
PF: predicated region fallthrough
CT: control target
= control target key end

     0   :  { %14 = vsyncpa [#allocation3], 0  ;;  %s1339_s0 = inlined_call_operand.hbm [shape: f32[8,784], index: 0, kind: input, shape index: {}]   ;;  %s1340_s1 = inlined_call_operand.hbm [shape: f32[784,256], index: 1, kind: input, shape index: {}]   ;;  %s1341_s2 = inlined_call_operand.vmem [shape: f32[1,256], index: 2, kind: input, shape index: {}]   ;;  %s1342_s3 = inlined_call_operand.hbm [shape: f32[256,128], index: 3, kind: input, shape index: {}]   ;;  %s1343_s4 = inlined_call_operand.vmem [shape: f32[1,128], index: 4, kind: input, shape index: {}]   ;;  %s1344_s5 = inlined_call_operand.hbm [shape: f32[128,128], index: 5, kind: input, shape index: {}]   ;;  %s1345_s6 = inlined_call_operand.vmem [shape: f32[1,128], index: 6, kind: input, shape index: {}]   ;;  %s1346_s7 = inlined_call_operand.hbm [shape: f32[128,128], index: 7, kind: input, shape index: {}]   ;;  %s1347_s8 = inlined_call_operand.vmem [shape: f32[1,128], index: 8, kind: input, shape index: {}]   ;;  %s1348_s9 = inlined_call_operand.hbm [shape: f32[8,10], index: 9, kind: output, shape index: {}]  }
   0x1   :  { %15 = vsyncpa [#allocation6], 0 }
   0x2   :  { %16 = vsyncpa [#allocation9], 0 }
   0x3   :  { %17 = vsyncpa [#allocation4], 0  ;;  %s1203_s30 = smov [#allocation5]  }
   0x4   :  { %s33_s10 = sshll.u32 %s1203_s30, 4  ;;  %s34_s10 = int_to_ptr.vmem [resolvable:$true] %s33_s10 }
   0x5   :  { %s1083_s11 = scalar_lea.vmem %s34_s10, 25088  ;;  %p1088_p1 = scmp.lt.s32.totalorder %s34_s10, %s34_s10 }
   0x6   :  { %p1084_p0 = scmp.ne.s32.totalorder %s34_s10, %s1083_s11  ;;  %p1089_p2 = scmp.lt.s32.totalorder %s1083_s11, %s1083_s11 }
   0x8   :  { %p1090_p3 = por %p1089_p2, %p1088_p1 }
   0xa   :  { %p1091_p4 = pnand %p1090_p3, %p1084_p0 }
   0xc   :  { %1094 = shalt.err (!%p1091_p4)
}
   0xd   :  { %s1204_s12 = smov 256   ;;  %s1205_s13 = smov 16  }
   0xe   :  { %39 = dma.hbm_to_vmem [thread:$0]  %s1340_s1, 25088, %s34_s10, [#allocation6], %s1204_s12, %s1204_s12, %s1205_s13  }
   0xf   :  { %s1206_s16 = smov [#allocation8]   ;;  %s1207_s18 = smov [#allocation2]  }
  0x10   :  { %s61_s17 = sshll.u32 %s1206_s16, 4  ;;  %s24_s19 = sshll.u32 %s1207_s18, 4  ;;  %s62_s17 = int_to_ptr.vmem [resolvable:$true] %s61_s17  ;;  %s25_s19 = int_to_ptr.vmem [resolvable:$true] %s24_s19 }
  0x11   :  { %s1103_s20 = scalar_lea.vmem %s62_s17, 2048  ;;  %p1108_p6 = scmp.lt.s32.totalorder %s62_s17, %s62_s17 }
  0x12   :  { %p1104_p5 = scmp.ne.s32.totalorder %s62_s17, %s1103_s20  ;;  %p1109_p7 = scmp.lt.s32.totalorder %s1103_s20, %s1103_s20 }
  0x14   :  { %p1110_p8 = por %p1109_p7, %p1108_p6 }
  0x16   :  { %p1111_p9 = pnand %p1110_p8, %p1104_p5 }
  0x18   :  { %1114 = shalt.err (!%p1111_p9)
}
  0x19   :  { %s1208_s21 = smov 128   ;;  %s1209_s22 = smov 8  }
  0x1a   :  { %67 = dma.hbm_to_vmem [thread:$0]  %s1344_s5, 2048, %s62_s17, [#allocation9], %s1208_s21, %s1208_s21, %s1209_s22  }
  0x1b   :  { %s1123_s1 = scalar_lea.vmem %s25_s19, 896  ;;  %p1128_p11 = scmp.lt.s32.totalorder %s25_s19, %s25_s19 }
  0x1c   :  { %p1124_p10 = scmp.ne.s32.totalorder %s25_s19, %s1123_s1  ;;  %p1129_p12 = scmp.lt.s32.totalorder %s1123_s1, %s1123_s1 }
  0x1e   :  { %p1130_p13 = por %p1129_p12, %p1128_p11 }
  0x20   :  { %p1131_p0 = pnand %p1130_p13, %p1124_p10 }
  0x22   :  { %1134 = shalt.err (!%p1131_p0)
}
  0x23   :  { %27 = dma.hbm_to_vmem [thread:$0]  %s1339_s0, 896, %s25_s19, [#allocation3]  }
  0x24   :  { %s1210_s27 = smov [#allocation7]   ;;  %s1211_s29 = smov [#allocation10]  }
  0x25   :  { %s47_s28 = sshll.u32 %s1210_s27, 4  ;;  %s75_s30 = sshll.u32 %s1211_s29, 4  ;;  %s48_s28 = int_to_ptr.vmem [resolvable:$true] %s47_s28  ;;  %s76_s30 = int_to_ptr.vmem [resolvable:$true] %s75_s30 }
  0x26   :  { %s1143_s10 = scalar_lea.vmem %s48_s28, 4096  ;;  %p1148_p2 = scmp.lt.s32.totalorder %s48_s28, %s48_s28 }
  0x27   :  { %p1144_p1 = scmp.ne.s32.totalorder %s48_s28, %s1143_s10  ;;  %p1149_p3 = scmp.lt.s32.totalorder %s1143_s10, %s1143_s10 }
  0x29   :  { %p1150_p4 = por %p1149_p3, %p1148_p2 }
  0x2b   :  { %p1151_p5 = pnand %p1150_p4, %p1144_p1 }
  0x2d   :  { %1154 = shalt.err (!%p1151_p5)
}
  0x2e   :  { %53 = dma.hbm_to_vmem [thread:$0]  %s1342_s3, 4096, %s48_s28, [#allocation6], %s1208_s21, %s1208_s21, %s1209_s22  }
  0x2f   :  { %s1163_s0 = scalar_lea.vmem %s76_s30, 2048  ;;  %p1168_p7 = scmp.lt.s32.totalorder %s76_s30, %s76_s30 }
  0x30   :  { %p1164_p6 = scmp.ne.s32.totalorder %s76_s30, %s1163_s0  ;;  %p1169_p8 = scmp.lt.s32.totalorder %s1163_s0, %s1163_s0 }
  0x32   :  { %p1170_p9 = por %p1169_p8, %p1168_p7 }
  0x34   :  { %p1171_p10 = pnand %p1170_p9, %p1164_p6 }
  0x36   :  { %1174 = shalt.err (!%p1171_p10)
}
  0x37   :  { %81 = dma.hbm_to_vmem [thread:$0]  %s1346_s7, 2048, %s76_s30, [#allocation9], %s1208_s21, %s1208_s21, %s1209_s22  }
  0x38   :  { %1195 = dma.done.wait [#allocation3], 896  }
  0x39   :  { %1196 = vsyncadd [#allocation3], 4294966400 }
  0x3a   :  { %1197 = dma.done.wait [#allocation6], 29184  }
  0x3b   :  { %1198 = vsyncadd [#allocation6], 4294938112 }
  0x3c   :  { %1199 = dma.done.wait [#allocation9], 4096  }
  0x3d   :  { %1200 = vsyncadd [#allocation9], 4294963200  ;;  %v137_v0 = vld [vmem:[#allocation5 + $0xf8] sm:$0xff]  ;;  %v136_v1 = vld [vmem:[#allocation5 + $0xf0] sm:$0xff]  ;;  %vm314_vm0 = vcmask 130048   ;;  %vm1213_vm1 = vmmov 0  }
  0x3e   :  { %v135_v2 = vld [vmem:[#allocation5 + $0xe8] sm:$0xff]  ;;  %318 = vmatprep.subr.mxu0 %v137_v0  ;;  %v201_v3 = vld [vmem:[#allocation5 + $0x2f8] sm:$0xff]  ;;  %v134_v4 = vld [vmem:[#allocation5 + $0xe0] sm:$0xff]  ;;  %s1214_s18 = smov [#allocation11]   ;;  %vm901_vm2 = vcmask 80896  }
  0x3f   :  { %v200_v5 = vld [vmem:[#allocation5 + $0x2f0] sm:$0xff]  ;;  %319 = vmatpush1.msra.mxu0 %v136_v1  ;;  %389 = vmatprep.subr.mxu1 %v201_v3  ;;  %v133_v6 = vld [vmem:[#allocation5 + $0xd8] sm:$0xff]  ;;  %v199_v7 = vld [vmem:[#allocation5 + $0x2e8] sm:$0xff]  ;;  %s909_s19 = sshll.u32 %s1214_s18, 4  ;;  %s910_s19 = int_to_ptr.vmem [resolvable:$true] %s909_s19 }
  0x40   :  { %320 = vmatprep.subr.mxu0 %v135_v2  ;;  %390 = vmatpush1.msra.mxu1 %v200_v5  ;;  %v132_v8 = vld [vmem:[#allocation5 + $0xd0] sm:$0xff]  ;;  %v198_v9 = vld [vmem:[#allocation5 + $0x2e0] sm:$0xff]  ;;  %v197_v10 = vld [vmem:[#allocation5 + $0x2d8] sm:$0xff]  ;;  %s1175_s20 = scalar_lea.vmem %s910_s19, 128  ;;  %p1180_p12 = scmp.lt.s32.totalorder %s910_s19, %s910_s19 }
  0x41   :  { %321 = vmatpush1.msra.mxu0 %v134_v4  ;;  %391 = vmatprep.subr.mxu1 %v199_v7  ;;  %v131_v11 = vld [vmem:[#allocation5 + $0xc8] sm:$0xff]  ;;  %v196_v12 = vld [vmem:[#allocation5 + $0x2d0] sm:$0xff]  ;;  %v130_v13 = vld [vmem:[#allocation5 + $0xc0] sm:$0xff]  ;;  %p1176_p11 = scmp.ne.s32.totalorder %s910_s19, %s1175_s20  ;;  %p1181_p13 = scmp.lt.s32.totalorder %s1175_s20, %s1175_s20 }
  0x42   :  { %322 = vmatprep.subr.mxu0 %v133_v6  ;;  %392 = vmatpush1.msra.mxu1 %v198_v9  ;;  %v195_v14 = vld [vmem:[#allocation5 + $0x2c8] sm:$0xff]  ;;  %v129_v15 = vld [vmem:[#allocation5 + $0xb8] sm:$0xff]  ;;  %v194_v16 = vld [vmem:[#allocation5 + $0x2c0] sm:$0xff] }
  0x43   :  { %323 = vmatpush1.msra.mxu0 %v132_v8  ;;  %393 = vmatprep.subr.mxu1 %v197_v10  ;;  %v128_v17 = vld [vmem:[#allocation5 + $0xb0] sm:$0xff]  ;;  %v193_v18 = vld [vmem:[#allocation5 + $0x2b8] sm:$0xff]  ;;  %v127_v19 = vld [vmem:[#allocation5 + $0xa8] sm:$0xff]  ;;  %p1182_p0 = por %p1181_p13, %p1180_p12 }
  0x44   :  { %324 = vmatprep.subr.mxu0 %v131_v11  ;;  %394 = vmatpush1.msra.mxu1 %v196_v12  ;;  %v192_v20 = vld [vmem:[#allocation5 + $0x2b0] sm:$0xff]  ;;  %v126_v21 = vld [vmem:[#allocation5 + $0xa0] sm:$0xff]  ;;  %v191_v22 = vld [vmem:[#allocation5 + $0x2a8] sm:$0xff] }
  0x45   :  { %325 = vmatpush1.msra.mxu0 %v130_v13  ;;  %395 = vmatprep.subr.mxu1 %v195_v14  ;;  %v125_v23 = vld [vmem:[#allocation5 + $0x98] sm:$0xff]  ;;  %v190_v24 = vld [vmem:[#allocation5 + $0x2a0] sm:$0xff]  ;;  %v124_v25 = vld [vmem:[#allocation5 + $0x90] sm:$0xff]  ;;  %p1183_p1 = pnand %p1182_p0, %p1176_p11 }
  0x46   :  { %326 = vmatprep.subr.mxu0 %v129_v15  ;;  %396 = vmatpush1.msra.mxu1 %v194_v16  ;;  %v189_v26 = vld [vmem:[#allocation5 + $0x298] sm:$0xff]  ;;  %v123_v27 = vld [vmem:[#allocation5 + $0x88] sm:$0xff]  ;;  %v188_v28 = vld [vmem:[#allocation5 + $0x290] sm:$0xff] }
  0x47   :  { %327 = vmatpush1.msra.mxu0 %v128_v17  ;;  %397 = vmatprep.subr.mxu1 %v193_v18  ;;  %v122_v29 = vld [vmem:[#allocation5 + $0x80] sm:$0xff]  ;;  %v187_v30 = vld [vmem:[#allocation5 + $0x288] sm:$0xff]  ;;  %v121_v31 = vld [vmem:[#allocation5 + $0x78] sm:$0xff] }
  0x48   :  { %328 = vmatprep.subr.mxu0 %v127_v19  ;;  %398 = vmatpush1.msra.mxu1 %v192_v20  ;;  %v186_v32 = vld [vmem:[#allocation5 + $0x280] sm:$0xff]  ;;  %v120_v33 = vld [vmem:[#allocation5 + $0x70] sm:$0xff]  ;;  %v185_v34 = vld [vmem:[#allocation5 + $0x278] sm:$0xff] }
  0x49   :  { %329 = vmatpush1.msra.mxu0 %v126_v21  ;;  %399 = vmatprep.subr.mxu1 %v191_v22  ;;  %v119_v35 = vld [vmem:[#allocation5 + $0x68] sm:$0xff]  ;;  %v184_v36 = vld [vmem:[#allocation5 + $0x270] sm:$0xff]  ;;  %v118_v37 = vld [vmem:[#allocation5 + $0x60] sm:$0xff] }
  0x4a   :  { %330 = vmatprep.subr.mxu0 %v125_v23  ;;  %400 = vmatpush1.msra.mxu1 %v190_v24  ;;  %v183_v38 = vld [vmem:[#allocation5 + $0x268] sm:$0xff]  ;;  %v117_v39 = vld [vmem:[#allocation5 + $0x58] sm:$0xff]  ;;  %v182_v40 = vld [vmem:[#allocation5 + $0x260] sm:$0xff] }
  0x4b   :  { %331 = vmatpush1.msra.mxu0 %v124_v25  ;;  %401 = vmatprep.subr.mxu1 %v189_v26  ;;  %v116_v41 = vld [vmem:[#allocation5 + $0x50] sm:$0xff]  ;;  %v181_v42 = vld [vmem:[#allocation5 + $0x258] sm:$0xff]  ;;  %v115_v43 = vld [vmem:[#allocation5 + $0x48] sm:$0xff] }
  0x4c   :  { %332 = vmatprep.subr.mxu0 %v123_v27  ;;  %402 = vmatpush1.msra.mxu1 %v188_v28  ;;  %v180_v44 = vld [vmem:[#allocation5 + $0x250] sm:$0xff]  ;;  %v114_v45 = vld [vmem:[#allocation5 + $0x40] sm:$0xff]  ;;  %v179_v46 = vld [vmem:[#allocation5 + $0x248] sm:$0xff] }
  0x4d   :  { %333 = vmatpush1.msra.mxu0 %v122_v29  ;;  %403 = vmatprep.subr.mxu1 %v187_v30  ;;  %v113_v47 = vld [vmem:[#allocation5 + $0x38] sm:$0xff]  ;;  %v178_v48 = vld [vmem:[#allocation5 + $0x240] sm:$0xff]  ;;  %v112_v49 = vld [vmem:[#allocation5 + $0x30] sm:$0xff] }
  0x4e   :  { %334 = vmatprep.subr.mxu0 %v121_v31  ;;  %404 = vmatpush1.msra.mxu1 %v186_v32  ;;  %v177_v50 = vld [vmem:[#allocation5 + $0x238] sm:$0xff]  ;;  %v111_v51 = vld [vmem:[#allocation5 + $0x28] sm:$0xff]  ;;  %v176_v52 = vld [vmem:[#allocation5 + $0x230] sm:$0xff] }
  0x4f   :  { %335 = vmatpush1.msra.mxu0 %v120_v33  ;;  %405 = vmatprep.subr.mxu1 %v185_v34  ;;  %v110_v53 = vld [vmem:[#allocation5 + $0x20] sm:$0xff]  ;;  %v175_v54 = vld [vmem:[#allocation5 + $0x228] sm:$0xff]  ;;  %v109_v55 = vld [vmem:[#allocation5 + $0x18] sm:$0xff] }
  0x50   :  { %336 = vmatprep.subr.mxu0 %v119_v35  ;;  %406 = vmatpush1.msra.mxu1 %v184_v36  ;;  %v174_v56 = vld [vmem:[#allocation5 + $0x220] sm:$0xff]  ;;  %v108_v57 = vld [vmem:[#allocation5 + $0x10] sm:$0xff]  ;;  %v173_v58 = vld [vmem:[#allocation5 + $0x218] sm:$0xff] }
  0x51   :  { %337 = vmatpush1.msra.mxu0 %v118_v37  ;;  %407 = vmatprep.subr.mxu1 %v183_v38  ;;  %v107_v59 = vld [vmem:[#allocation5 + $0x8] sm:$0xff]  ;;  %v172_v60 = vld [vmem:[#allocation5 + $0x210] sm:$0xff]  ;;  %v106_v61 = vld [vmem:[#allocation5] sm:$0xff] }
  0x52   :  { %338 = vmatprep.subr.mxu0 %v117_v39  ;;  %408 = vmatpush1.msra.mxu1 %v182_v40  ;;  %v171_v62 = vld [vmem:[#allocation5 + $0x208] sm:$0xff]  ;;  %v169_v63 = vld [vmem:[#allocation5 + $0x1f8] sm:$0xff]  ;;  %v170_v0 = vld [vmem:[#allocation5 + $0x200] sm:$0xff] }
  0x53   :  { %339 = vmatpush1.msra.mxu0 %v116_v41  ;;  %409 = vmatprep.subr.mxu1 %v181_v42  ;;  %v168_v1 = vld [vmem:[#allocation5 + $0x1f0] sm:$0xff]  ;;  %v233_v2 = vld [vmem:[#allocation5 + $0x3f8] sm:$0xff]  ;;  %v167_v3 = vld [vmem:[#allocation5 + $0x1e8] sm:$0xff] }
  0x54   :  { %340 = vmatprep.subr.mxu0 %v115_v43  ;;  %410 = vmatpush1.msra.mxu1 %v180_v44  ;;  %v232_v4 = vld [vmem:[#allocation5 + $0x3f0] sm:$0xff]  ;;  %v166_v5 = vld [vmem:[#allocation5 + $0x1e0] sm:$0xff]  ;;  %v231_v6 = vld [vmem:[#allocation5 + $0x3e8] sm:$0xff] }
  0x55   :  { %341 = vmatpush1.msra.mxu0 %v114_v45  ;;  %411 = vmatprep.subr.mxu1 %v179_v46  ;;  %v165_v7 = vld [vmem:[#allocation5 + $0x1d8] sm:$0xff]  ;;  %v230_v8 = vld [vmem:[#allocation5 + $0x3e0] sm:$0xff]  ;;  %v164_v9 = vld [vmem:[#allocation5 + $0x1d0] sm:$0xff] }
  0x56   :  { %342 = vmatprep.subr.mxu0 %v113_v47  ;;  %412 = vmatpush1.msra.mxu1 %v178_v48  ;;  %v229_v10 = vld [vmem:[#allocation5 + $0x3d8] sm:$0xff]  ;;  %v163_v11 = vld [vmem:[#allocation5 + $0x1c8] sm:$0xff]  ;;  %v228_v12 = vld [vmem:[#allocation5 + $0x3d0] sm:$0xff] }
  0x57   :  { %343 = vmatpush1.msra.mxu0 %v112_v49  ;;  %413 = vmatprep.subr.mxu1 %v177_v50  ;;  %v162_v13 = vld [vmem:[#allocation5 + $0x1c0] sm:$0xff]  ;;  %v227_v14 = vld [vmem:[#allocation5 + $0x3c8] sm:$0xff]  ;;  %v161_v15 = vld [vmem:[#allocation5 + $0x1b8] sm:$0xff] }
  0x58   :  { %344 = vmatprep.subr.mxu0 %v111_v51  ;;  %414 = vmatpush1.msra.mxu1 %v176_v52  ;;  %v226_v16 = vld [vmem:[#allocation5 + $0x3c0] sm:$0xff]  ;;  %v160_v17 = vld [vmem:[#allocation5 + $0x1b0] sm:$0xff]  ;;  %v225_v18 = vld [vmem:[#allocation5 + $0x3b8] sm:$0xff] }
  0x59   :  { %345 = vmatpush1.msra.mxu0 %v110_v53  ;;  %415 = vmatprep.subr.mxu1 %v175_v54  ;;  %v159_v19 = vld [vmem:[#allocation5 + $0x1a8] sm:$0xff]  ;;  %v224_v20 = vld [vmem:[#allocation5 + $0x3b0] sm:$0xff]  ;;  %v158_v21 = vld [vmem:[#allocation5 + $0x1a0] sm:$0xff] }
  0x5a   :  { %346 = vmatprep.subr.mxu0 %v109_v55  ;;  %416 = vmatpush1.msra.mxu1 %v174_v56  ;;  %v223_v22 = vld [vmem:[#allocation5 + $0x3a8] sm:$0xff]  ;;  %v157_v23 = vld [vmem:[#allocation5 + $0x198] sm:$0xff]  ;;  %v222_v24 = vld [vmem:[#allocation5 + $0x3a0] sm:$0xff] }
  0x5b   :  { %347 = vmatpush1.msra.mxu0 %v108_v57  ;;  %417 = vmatprep.subr.mxu1 %v173_v58  ;;  %v156_v25 = vld [vmem:[#allocation5 + $0x190] sm:$0xff]  ;;  %v221_v26 = vld [vmem:[#allocation5 + $0x398] sm:$0xff]  ;;  %v155_v27 = vld [vmem:[#allocation5 + $0x188] sm:$0xff] }
  0x5c   :  { %348 = vmatprep.subr.mxu0 %v107_v59  ;;  %418 = vmatpush1.msra.mxu1 %v172_v60  ;;  %v220_v28 = vld [vmem:[#allocation5 + $0x390] sm:$0xff]  ;;  %v154_v29 = vld [vmem:[#allocation5 + $0x180] sm:$0xff]  ;;  %v219_v30 = vld [vmem:[#allocation5 + $0x388] sm:$0xff] }
  0x5d   :  { %349 = vmatpush1.msra.mxu0 %v106_v61  ;;  %419 = vmatprep.subr.mxu1 %v171_v62  ;;  %v153_v31 = vld [vmem:[#allocation5 + $0x178] sm:$0xff]  ;;  %v218_v32 = vld [vmem:[#allocation5 + $0x380] sm:$0xff]  ;;  %v152_v33 = vld [vmem:[#allocation5 + $0x170] sm:$0xff] }
  0x5e   :  { %350 = vmatprep.subr.mxu0 %v169_v63  ;;  %420 = vmatpush1.msra.mxu1 %v170_v0  ;;  %v217_v34 = vld [vmem:[#allocation5 + $0x378] sm:$0xff]  ;;  %v151_v35 = vld [vmem:[#allocation5 + $0x168] sm:$0xff]  ;;  %v216_v36 = vld [vmem:[#allocation5 + $0x370] sm:$0xff] }
  0x5f   :  { %351 = vmatpush2.msra.mxu0 %v168_v1  ;;  %421 = vmatprep.subr.mxu1 %v233_v2  ;;  %v150_v37 = vld [vmem:[#allocation5 + $0x160] sm:$0xff]  ;;  %v215_v38 = vld [vmem:[#allocation5 + $0x368] sm:$0xff]  ;;  %v149_v39 = vld [vmem:[#allocation5 + $0x158] sm:$0xff] }
  0x60   :  { %352 = vmatprep.subr.mxu0 %v167_v3  ;;  %422 = vmatpush2.msra.mxu1 %v232_v4  ;;  %v214_v40 = vld [vmem:[#allocation5 + $0x360] sm:$0xff]  ;;  %v148_v41 = vld [vmem:[#allocation5 + $0x150] sm:$0xff]  ;;  %v213_v42 = vld [vmem:[#allocation5 + $0x358] sm:$0xff] }
  0x61   :  { %353 = vmatpush2.msra.mxu0 %v166_v5  ;;  %423 = vmatprep.subr.mxu1 %v231_v6  ;;  %v147_v43 = vld [vmem:[#allocation5 + $0x148] sm:$0xff]  ;;  %v212_v44 = vld [vmem:[#allocation5 + $0x350] sm:$0xff]  ;;  %v146_v45 = vld [vmem:[#allocation5 + $0x140] sm:$0xff] }
  0x62   :  { %354 = vmatprep.subr.mxu0 %v165_v7  ;;  %424 = vmatpush2.msra.mxu1 %v230_v8  ;;  %v211_v46 = vld [vmem:[#allocation5 + $0x348] sm:$0xff]  ;;  %v145_v47 = vld [vmem:[#allocation5 + $0x138] sm:$0xff]  ;;  %v210_v48 = vld [vmem:[#allocation5 + $0x340] sm:$0xff] }
  0x63   :  { %355 = vmatpush2.msra.mxu0 %v164_v9  ;;  %425 = vmatprep.subr.mxu1 %v229_v10  ;;  %v144_v49 = vld [vmem:[#allocation5 + $0x130] sm:$0xff]  ;;  %v209_v50 = vld [vmem:[#allocation5 + $0x338] sm:$0xff]  ;;  %v143_v51 = vld [vmem:[#allocation5 + $0x128] sm:$0xff] }
  0x64   :  { %356 = vmatprep.subr.mxu0 %v163_v11  ;;  %426 = vmatpush2.msra.mxu1 %v228_v12  ;;  %v208_v52 = vld [vmem:[#allocation5 + $0x330] sm:$0xff]  ;;  %v142_v53 = vld [vmem:[#allocation5 + $0x120] sm:$0xff]  ;;  %v207_v54 = vld [vmem:[#allocation5 + $0x328] sm:$0xff] }
  0x65   :  { %357 = vmatpush2.msra.mxu0 %v162_v13  ;;  %427 = vmatprep.subr.mxu1 %v227_v14  ;;  %v141_v55 = vld [vmem:[#allocation5 + $0x118] sm:$0xff]  ;;  %v206_v56 = vld [vmem:[#allocation5 + $0x320] sm:$0xff]  ;;  %v140_v57 = vld [vmem:[#allocation5 + $0x110] sm:$0xff] }
  0x66   :  { %358 = vmatprep.subr.mxu0 %v161_v15  ;;  %428 = vmatpush2.msra.mxu1 %v226_v16  ;;  %v205_v58 = vld [vmem:[#allocation5 + $0x318] sm:$0xff]  ;;  %v139_v59 = vld [vmem:[#allocation5 + $0x108] sm:$0xff]  ;;  %v100_v60 = vld [vmem:[#allocation2 + $0x8] sm:$0xff] }
  0x67   :  { %359 = vmatpush2.msra.mxu0 %v160_v17  ;;  %429 = vmatprep.subr.mxu1 %v225_v18  ;;  %v138_v61 = vld [vmem:[#allocation5 + $0x100] sm:$0xff]  ;;  %v204_v62 = vld [vmem:[#allocation5 + $0x310] sm:$0xff]  ;;  %v99_v63 = vld [vmem:[#allocation2] sm:$0xff] }
  0x68   :  { %360 = vmatprep.subr.mxu0 %v159_v19  ;;  %430 = vmatpush2.msra.mxu1 %v224_v20  ;;  %v203_v0 = vld [vmem:[#allocation5 + $0x308] sm:$0xff]  ;;  %v265_v1 = vld [vmem:[#allocation5 + $0x4f8] sm:$0xff]  ;;  %v202_v2 = vld [vmem:[#allocation5 + $0x300] sm:$0xff] }
  0x69   :  { %361 = vmatpush2.msra.mxu0 %v158_v21  ;;  %431 = vmatprep.subr.mxu1 %v223_v22  ;;  %v102_v3 = vld [vmem:[#allocation2 + $0x18] sm:$0xff]  ;;  %v264_v4 = vld [vmem:[#allocation5 + $0x4f0] sm:$0xff]  ;;  %v101_v5 = vld [vmem:[#allocation2 + $0x10] sm:$0xff]  ;;  %v1212_v22 = vmov 0.0  }
  0x6a   :  { %362 = vmatprep.subr.mxu0 %v157_v23  ;;  %432 = vmatpush2.msra.mxu1 %v222_v24  ;;  %v263_v6 = vld [vmem:[#allocation5 + $0x4e8] sm:$0xff]  ;;  %v262_v7 = vld [vmem:[#allocation5 + $0x4e0] sm:$0xff]  ;;  %v301_v8 = vld [vmem:[#allocation5 + $0x618] sm:$0xff] }
  0x6b   :  { %363 = vmatpush2.msra.mxu0 %v156_v25  ;;  %433 = vmatprep.subr.mxu1 %v221_v26  ;;  %v261_v9 = vld [vmem:[#allocation5 + $0x4d8] sm:$0xff]  ;;  %v300_v10 = vld [vmem:[#allocation5 + $0x610] sm:$0xff]  ;;  %v299_v12 = vld [vmem:[#allocation5 + $0x608] sm:$0xff] }
  0x6c   :  { %364 = vmatprep.subr.mxu0 %v155_v27  ;;  %434 = vmatpush2.msra.mxu1 %v220_v28  ;;  %v260_v11 = vld [vmem:[#allocation5 + $0x4d0] sm:$0xff]  ;;  %v259_v13 = vld [vmem:[#allocation5 + $0x4c8] sm:$0xff]  ;;  %v258_v15 = vld [vmem:[#allocation5 + $0x4c0] sm:$0xff] }
  0x6d   :  { %365 = vmatpush2.msra.mxu0 %v154_v29  ;;  %435 = vmatprep.subr.mxu1 %v219_v30  ;;  %v104_v14 = vld [vmem:[#allocation2 + $0x28] sm:$0xff]  ;;  %v298_v16 = vld [vmem:[#allocation5 + $0x600] sm:$0xff]  ;;  %v257_v17 = vld [vmem:[#allocation5 + $0x4b8] sm:$0xff] }
  0x6e   :  { %366 = vmatprep.subr.mxu0 %v153_v31  ;;  %436 = vmatpush2.msra.mxu1 %v218_v32  ;;  %v256_v18 = vld [vmem:[#allocation5 + $0x4b0] sm:$0xff]  ;;  %v105_v19 = vld [vmem:[#allocation2 + $0x30] sm:$0xff]  ;;  %v255_v20 = vld [vmem:[#allocation5 + $0x4a8] sm:$0xff] }
  0x6f   :  { %367 = vmatpush2.msra.mxu0 %v152_v33  ;;  %437 = vmatprep.subr.mxu1 %v217_v34  ;;  %v254_v21 = vld [vmem:[#allocation5 + $0x4a0] sm:$0xff]  ;;  %v253_v23 = vld [vmem:[#allocation5 + $0x498] sm:$0xff]  ;;  %v252_v24 = vld [vmem:[#allocation5 + $0x490] sm:$0xff] }
  0x70   :  { %368 = vmatprep.subr.mxu0 %v151_v35  ;;  %438 = vmatpush2.msra.mxu1 %v216_v36  ;;  %v251_v25 = vld [vmem:[#allocation5 + $0x488] sm:$0xff]  ;;  %v250_v26 = vld [vmem:[#allocation5 + $0x480] sm:$0xff]  ;;  %v249_v27 = vld [vmem:[#allocation5 + $0x478] sm:$0xff] }
  0x71   :  { %369 = vmatpush2.msra.mxu0 %v150_v37  ;;  %439 = vmatprep.subr.mxu1 %v215_v38  ;;  %v248_v28 = vld [vmem:[#allocation5 + $0x470] sm:$0xff]  ;;  %v247_v29 = vld [vmem:[#allocation5 + $0x468] sm:$0xff]  ;;  %v246_v30 = vld [vmem:[#allocation5 + $0x460] sm:$0xff] }
  0x72   :  { %370 = vmatprep.subr.mxu0 %v149_v39  ;;  %440 = vmatpush2.msra.mxu1 %v214_v40  ;;  %v245_v31 = vld [vmem:[#allocation5 + $0x458] sm:$0xff]  ;;  %v244_v32 = vld [vmem:[#allocation5 + $0x450] sm:$0xff]  ;;  %v243_v33 = vld [vmem:[#allocation5 + $0x448] sm:$0xff] }
  0x73   :  { %371 = vmatpush2.msra.mxu0 %v148_v41  ;;  %441 = vmatprep.subr.mxu1 %v213_v42  ;;  %v242_v34 = vld [vmem:[#allocation5 + $0x440] sm:$0xff]  ;;  %v241_v35 = vld [vmem:[#allocation5 + $0x438] sm:$0xff]  ;;  %v240_v36 = vld [vmem:[#allocation5 + $0x430] sm:$0xff] }
  0x74   :  { %372 = vmatprep.subr.mxu0 %v147_v43  ;;  %442 = vmatpush2.msra.mxu1 %v212_v44  ;;  %v239_v37 = vld [vmem:[#allocation5 + $0x428] sm:$0xff]  ;;  %v238_v38 = vld [vmem:[#allocation5 + $0x420] sm:$0xff]  ;;  %v237_v39 = vld [vmem:[#allocation5 + $0x418] sm:$0xff] }
  0x75   :  { %373 = vmatpush2.msra.mxu0 %v146_v45  ;;  %443 = vmatprep.subr.mxu1 %v211_v46  ;;  %v236_v40 = vld [vmem:[#allocation5 + $0x410] sm:$0xff]  ;;  %v235_v41 = vld [vmem:[#allocation5 + $0x408] sm:$0xff]  ;;  %v234_v42 = vld [vmem:[#allocation5 + $0x400] sm:$0xff] }
  0x76   :  { %374 = vmatprep.subr.mxu0 %v145_v47  ;;  %444 = vmatpush2.msra.mxu1 %v210_v48  ;;  %v297_v43 = vld [vmem:[#allocation5 + $0x5f8] sm:$0xff]  ;;  %v296_v44 = vld [vmem:[#allocation5 + $0x5f0] sm:$0xff]  ;;  %v295_v45 = vld [vmem:[#allocation5 + $0x5e8] sm:$0xff] }
  0x77   :  { %375 = vmatpush2.msra.mxu0 %v144_v49  ;;  %445 = vmatprep.subr.mxu1 %v209_v50  ;;  %v294_v46 = vld [vmem:[#allocation5 + $0x5e0] sm:$0xff]  ;;  %v293_v47 = vld [vmem:[#allocation5 + $0x5d8] sm:$0xff]  ;;  %v292_v48 = vld [vmem:[#allocation5 + $0x5d0] sm:$0xff] }
  0x78   :  { %376 = vmatprep.subr.mxu0 %v143_v51  ;;  %446 = vmatpush2.msra.mxu1 %v208_v52  ;;  %v291_v49 = vld [vmem:[#allocation5 + $0x5c8] sm:$0xff]  ;;  %v290_v50 = vld [vmem:[#allocation5 + $0x5c0] sm:$0xff]  ;;  %v289_v51 = vld [vmem:[#allocation5 + $0x5b8] sm:$0xff] }
  0x79   :  { %377 = vmatpush2.msra.mxu0 %v142_v53  ;;  %447 = vmatprep.subr.mxu1 %v207_v54  ;;  %v288_v52 = vld [vmem:[#allocation5 + $0x5b0] sm:$0xff]  ;;  %v287_v53 = vld [vmem:[#allocation5 + $0x5a8] sm:$0xff]  ;;  %v286_v54 = vld [vmem:[#allocation5 + $0x5a0] sm:$0xff] }
  0x7a   :  { %378 = vmatprep.subr.mxu0 %v141_v55  ;;  %448 = vmatpush2.msra.mxu1 %v206_v56  ;;  %v285_v55 = vld [vmem:[#allocation5 + $0x598] sm:$0xff]  ;;  %v284_v56 = vld [vmem:[#allocation5 + $0x590] sm:$0xff] }
  0x7b   :  { %379 = vmatpush2.msra.mxu0 %v140_v57  ;;  %449 = vmatprep.subr.mxu1 %v205_v58  ;;  %v283_v57 = vld [vmem:[#allocation5 + $0x588] sm:$0xff]  ;;  %v282_v58 = vld [vmem:[#allocation5 + $0x580] sm:$0xff] }
  0x7c   :  { %380 = vmatprep.subr.mxu0 %v139_v59  ;;  %382 = vmatprep.mubr.f32.mxu0 %v100_v60  ;;  %v281_v59 = vld [vmem:[#allocation5 + $0x578] sm:$0xff]  ;;  %v280_v60 = vld [vmem:[#allocation5 + $0x570] sm:$0xff] }
  0x7d   :  { %381 = vmatpush2.msra.mxu0 %v138_v61  ;;  %450 = vmatpush2.msra.mxu1 %v204_v62  ;;  %v279_v61 = vld [vmem:[#allocation5 + $0x568] sm:$0xff]  ;;  %v278_v62 = vld [vmem:[#allocation5 + $0x560] sm:$0xff] }
  0x7e   :  { %383 = vmatmul.mubr.f32.vlgmr.msra.gmra.mxu0 %v99_v63  ;;  %451 = vmatprep.subr.mxu1 %v203_v0  ;;  %v277_v63 = vld [vmem:[#allocation5 + $0x558] sm:$0xff]  ;;  %v276_v0 = vld [vmem:[#allocation5 + $0x550] sm:$0xff] }
  0x7f   :  { %460 = vmatprep.subr.mxu0 %v265_v1  ;;  %452 = vmatpush2.msra.mxu1 %v202_v2  ;;  %v275_v1 = vld [vmem:[#allocation5 + $0x548] sm:$0xff]  ;;  %v274_v2 = vld [vmem:[#allocation5 + $0x540] sm:$0xff] }
  0x80   :  { %453 = vmatprep.mubr.f32.mxu1 %v102_v3  ;;  %461 = vmatpush1.msra.mxu0 %v264_v4  ;;  %v273_v3 = vld [vmem:[#allocation5 + $0x538] sm:$0xff]  ;;  %v272_v4 = vld [vmem:[#allocation5 + $0x530] sm:$0xff] }
  0x81   :  { %454 = vmatmul.mubr.f32.vlgmr.msra.gmra.mxu1 %v101_v5  ;;  %462 = vmatprep.subr.mxu0 %v263_v6  ;;  %v271_v5 = vld [vmem:[#allocation5 + $0x528] sm:$0xff]  ;;  %v270_v6 = vld [vmem:[#allocation5 + $0x520] sm:$0xff] }
  0x82   :  { %463 = vmatpush1.msra.mxu0 %v262_v7  ;;  %559 = vmatprep.subr.mxu1 %v301_v8  ;;  %v269_v7 = vld [vmem:[#allocation5 + $0x518] sm:$0xff]  ;;  %v268_v8 = vld [vmem:[#allocation5 + $0x510] sm:$0xff] }
  0x83   :  { %464 = vmatprep.subr.mxu0 %v261_v9  ;;  %560 = vmatpush1.msra.mxu1 %v300_v10  ;;  %v267_v9 = vld [vmem:[#allocation5 + $0x508] sm:$0xff]  ;;  %v266_v10 = vld [vmem:[#allocation5 + $0x500] sm:$0xff] }
  0x84   :  { %465 = vmatpush1.msra.mxu0 %v260_v11  ;;  %561 = vmatprep.subr.mxu1 %v299_v12  ;;  %v103_v11 = vld [vmem:[#allocation2 + $0x20] sm:$0xff]  ;;  %v635_v12 = vld [vmem:[#allocation7 + $0xf8] sm:$0xff] }
  0x85   :  { %466 = vmatprep.subr.mxu0 %v259_v13  ;;  %524 = vmatprep.mubr.f32.mxu0 %v104_v14  ;;  %v619_v13 = vld [vmem:[#allocation7 + $0x78] sm:$0xff]  ;;  %v634_v14 = vld [vmem:[#allocation7 + $0xf0] sm:$0xff] }
  0x86   :  { %467 = vmatpush1.msra.mxu0 %v258_v15  ;;  %562 = vmatpush1.msra.mxu1 %v298_v16  ;;  %v618_v15 = vld [vmem:[#allocation7 + $0x70] sm:$0xff]  ;;  %v633_v16 = vld [vmem:[#allocation7 + $0xe8] sm:$0xff] }
  0x87   :  { %468 = vmatprep.subr.mxu0 %v257_v17  ;;  %595 = vmatprep.mubr.f32.mxu1 %v1212_v22  ;;  %v617_v17 = vld [vmem:[#allocation7 + $0x68] sm:$0xff] }
  0x88   :  { %469 = vmatpush1.msra.mxu0 %v256_v18  ;;  %920 = vmatmul.mubr.msk.f32.vlgmr.msra.gmra.mxu1 %vm314_vm0, %v105_v19  ;;  %v632_v18 = vld [vmem:[#allocation7 + $0xe0] sm:$0xff] }
  0x89   :  { %470 = vmatprep.subr.mxu0 %v255_v20  ;;  %924 = vmatprep.subr.mxu1 %v635_v12  ;;  %v616_v19 = vld [vmem:[#allocation7 + $0x60] sm:$0xff]  ;;  %v631_v20 = vld [vmem:[#allocation7 + $0xd8] sm:$0xff]  ;;  %v723_v12 = vld [vmem:[#allocation8 + $0x48] sm:$0xff] }
  0x8a   :  { %471 = vmatpush1.msra.mxu0 %v254_v21  ;;  %925 = vmatpush3.msra.mxu1 %v619_v13  ;;  %v615_v21 = vld [vmem:[#allocation7 + $0x58] sm:$0xff]  ;;  %v722_v13 = vld [vmem:[#allocation8 + $0x40] sm:$0xff] }
  0x8b   :  { %472 = vmatprep.subr.mxu0 %v253_v23  ;;  %926 = vmatprep.subr.mxu1 %v634_v14  ;;  %v630_v23 = vld [vmem:[#allocation7 + $0xd0] sm:$0xff]  ;;  %v721_v14 = vld [vmem:[#allocation8 + $0x38] sm:$0xff] }
  0x8c   :  { %473 = vmatpush1.msra.mxu0 %v252_v24  ;;  %927 = vmatpush3.msra.mxu1 %v618_v15  ;;  %v614_v24 = vld [vmem:[#allocation7 + $0x50] sm:$0xff] }
  0x8d   :  { %474 = vmatprep.subr.mxu0 %v251_v25  ;;  %928 = vmatprep.subr.mxu1 %v633_v16  ;;  %v629_v25 = vld [vmem:[#allocation7 + $0xc8] sm:$0xff]  ;;  %v720_v15 = vld [vmem:[#allocation8 + $0x30] sm:$0xff] }
  0x8e   :  { %475 = vmatpush1.msra.mxu0 %v250_v26  ;;  %929 = vmatpush3.msra.mxu1 %v617_v17  ;;  %v613_v26 = vld [vmem:[#allocation7 + $0x48] sm:$0xff]  ;;  %v718_v17 = vld [vmem:[#allocation8 + $0x20] sm:$0xff] }
  0x8f   :  { %476 = vmatprep.subr.mxu0 %v249_v27  ;;  %930 = vmatprep.subr.mxu1 %v632_v18  ;;  %v628_v27 = vld [vmem:[#allocation7 + $0xc0] sm:$0xff]  ;;  %v719_v16 = vld [vmem:[#allocation8 + $0x28] sm:$0xff]  ;;  %v717_v18 = vld [vmem:[#allocation8 + $0x18] sm:$0xff] }
  0x90   :  { %477 = vmatpush1.msra.mxu0 %v248_v28  ;;  %931 = vmatpush3.msra.mxu1 %v616_v19  ;;  %v612_v28 = vld [vmem:[#allocation7 + $0x40] sm:$0xff]  ;;  %v716_v19 = vld [vmem:[#allocation8 + $0x10] sm:$0xff] }
  0x91   :  { %478 = vmatprep.subr.mxu0 %v247_v29  ;;  %932 = vmatprep.subr.mxu1 %v631_v20  ;;  %v627_v29 = vld [vmem:[#allocation7 + $0xb8] sm:$0xff]  ;;  %v715_v20 = vld [vmem:[#allocation8 + $0x8] sm:$0xff] }
  0x92   :  { %479 = vmatpush1.msra.mxu0 %v246_v30  ;;  %933 = vmatpush3.msra.mxu1 %v615_v21  ;;  %v611_v30 = vld [vmem:[#allocation7 + $0x38] sm:$0xff]  ;;  %v714_v21 = vld [vmem:[#allocation8] sm:$0xff] }
  0x93   :  { %480 = vmatprep.subr.mxu0 %v245_v31  ;;  %934 = vmatprep.subr.mxu1 %v630_v23  ;;  %v626_v31 = vld [vmem:[#allocation7 + $0xb0] sm:$0xff]  ;;  %v823_v23 = vld [vmem:[#allocation10 + $0x78] sm:$0xff] }
  0x94   :  { %481 = vmatpush1.msra.mxu0 %v244_v32  ;;  %935 = vmatpush3.msra.mxu1 %v614_v24  ;;  %v610_v32 = vld [vmem:[#allocation7 + $0x30] sm:$0xff] }
  0x95   :  { %482 = vmatprep.subr.mxu0 %v243_v33  ;;  %936 = vmatprep.subr.mxu1 %v629_v25  ;;  %v625_v33 = vld [vmem:[#allocation7 + $0xa8] sm:$0xff]  ;;  %v822_v24 = vld [vmem:[#allocation10 + $0x70] sm:$0xff] }
  0x96   :  { %483 = vmatpush1.msra.mxu0 %v242_v34  ;;  %937 = vmatpush3.msra.mxu1 %v613_v26  ;;  %v609_v34 = vld [vmem:[#allocation7 + $0x28] sm:$0xff]  ;;  %v820_v26 = vld [vmem:[#allocation10 + $0x60] sm:$0xff] }
  0x97   :  { %484 = vmatprep.subr.mxu0 %v241_v35  ;;  %938 = vmatprep.subr.mxu1 %v628_v27  ;;  %v624_v35 = vld [vmem:[#allocation7 + $0xa0] sm:$0xff]  ;;  %v821_v25 = vld [vmem:[#allocation10 + $0x68] sm:$0xff]  ;;  %v819_v27 = vld [vmem:[#allocation10 + $0x58] sm:$0xff] }
  0x98   :  { %485 = vmatpush1.msra.mxu0 %v240_v36  ;;  %939 = vmatpush3.msra.mxu1 %v612_v28  ;;  %v608_v36 = vld [vmem:[#allocation7 + $0x20] sm:$0xff]  ;;  %v818_v28 = vld [vmem:[#allocation10 + $0x50] sm:$0xff] }
  0x99   :  { %486 = vmatprep.subr.mxu0 %v239_v37  ;;  %940 = vmatprep.subr.mxu1 %v627_v29  ;;  %v623_v37 = vld [vmem:[#allocation7 + $0x98] sm:$0xff]  ;;  %v817_v29 = vld [vmem:[#allocation10 + $0x48] sm:$0xff] }
  0x9a   :  { %487 = vmatpush1.msra.mxu0 %v238_v38  ;;  %941 = vmatpush3.msra.mxu1 %v611_v30  ;;  %v607_v38 = vld [vmem:[#allocation7 + $0x18] sm:$0xff]  ;;  %v816_v30 = vld [vmem:[#allocation10 + $0x40] sm:$0xff] }
  0x9b   :  { %488 = vmatprep.subr.mxu0 %v237_v39  ;;  %942 = vmatprep.subr.mxu1 %v626_v31  ;;  %v622_v39 = vld [vmem:[#allocation7 + $0x90] sm:$0xff]  ;;  %v815_v31 = vld [vmem:[#allocation10 + $0x38] sm:$0xff] }
  0x9c   :  { %489 = vmatpush1.msra.mxu0 %v236_v40  ;;  %943 = vmatpush3.msra.mxu1 %v610_v32  ;;  %v606_v40 = vld [vmem:[#allocation7 + $0x10] sm:$0xff] }
  0x9d   :  { %490 = vmatprep.subr.mxu0 %v235_v41  ;;  %944 = vmatprep.subr.mxu1 %v625_v33  ;;  %v621_v41 = vld [vmem:[#allocation7 + $0x88] sm:$0xff]  ;;  %v814_v32 = vld [vmem:[#allocation10 + $0x30] sm:$0xff] }
  0x9e   :  { %491 = vmatpush1.msra.mxu0 %v234_v42  ;;  %945 = vmatpush3.msra.mxu1 %v609_v34  ;;  %v605_v42 = vld [vmem:[#allocation7 + $0x8] sm:$0xff]  ;;  %v812_v34 = vld [vmem:[#allocation10 + $0x20] sm:$0xff] }
  0x9f   :  { %492 = vmatprep.subr.mxu0 %v297_v43  ;;  %946 = vmatprep.subr.mxu1 %v624_v35  ;;  %v620_v43 = vld [vmem:[#allocation7 + $0x80] sm:$0xff]  ;;  %v813_v33 = vld [vmem:[#allocation10 + $0x28] sm:$0xff]  ;;  %v811_v35 = vld [vmem:[#allocation10 + $0x18] sm:$0xff] }
  0xa0   :  { %493 = vmatpush2.msra.mxu0 %v296_v44  ;;  %947 = vmatpush3.msra.mxu1 %v608_v36  ;;  %v604_v44 = vld [vmem:[#allocation7] sm:$0xff] }
  0xa1   :  { %494 = vmatprep.subr.mxu0 %v295_v45  ;;  %948 = vmatprep.subr.mxu1 %v623_v37  ;;  %v304_v45 = vlaneseq  ;;  %v921_v37 = vld [vmem:[%s1343_s4] ss:$0 sm:$0xff] }
  0xa2   :  { %495 = vmatpush2.msra.mxu0 %v294_v46  ;;  %949 = vmatpush3.msra.mxu1 %v607_v38 }
  0xa3   :  { %496 = vmatprep.subr.mxu0 %v293_v47  ;;  %950 = vmatprep.subr.mxu1 %v622_v39  ;;  %v305_v46 = vshrl.u32 %v304_v45, 7  ;;  %v922_v45 = vld [vmem:[%s1345_s6] ss:$0 sm:$0xff] }
  0xa4   :  { %497 = vmatpush2.msra.mxu0 %v292_v48  ;;  %951 = vmatpush3.msra.mxu1 %v606_v40  ;;  %v302_v48 = vld [vmem:[%s1341_s2] sm:$0x3] }
  0xa5   :  { %498 = vmatprep.subr.mxu0 %v291_v49  ;;  %952 = vmatprep.subr.mxu1 %v621_v41  ;;  %v306_v47 = vsub.s32 0, %v305_v46  ;;  %v310_v49 = vsub.s32 1, %v305_v46 }
  0xa6   :  { %499 = vmatpush2.msra.mxu0 %v290_v50  ;;  %953 = vmatpush3.msra.mxu1 %v605_v42  ;;  %v810_v42 = vld [vmem:[#allocation10 + $0x10] sm:$0xff] }
  0xa7   :  { %500 = vmatprep.subr.mxu0 %v289_v51  ;;  %954 = vmatprep.subr.mxu1 %v620_v43  ;;  %v307_v51 = vrot.slane %v302_v48, %v306_v47  ;;  %v809_v43 = vld [vmem:[#allocation10 + $0x8] sm:$0xff] }
  0xa8   :  { %501 = vmatpush2.msra.mxu0 %v288_v52  ;;  %955 = vmatpush3.msra.mxu1 %v604_v44  ;;  %v311_v52 = vrot.slane %v302_v48, %v310_v49  ;;  %v808_v44 = vld [vmem:[#allocation10] sm:$0xff] }
  0xa9   :  { %502 = vmatprep.subr.mxu0 %v287_v53  ;;  %993 = vmatprep.subr.mxu1 %v1212_v22 }
  0xaa   :  { %503 = vmatpush2.msra.mxu0 %v286_v54 }
  0xab   :  { %504 = vmatprep.subr.mxu0 %v285_v55 }
  0xac   :  { %505 = vmatpush2.msra.mxu0 %v284_v56 }
  0xad   :  { %506 = vmatprep.subr.mxu0 %v283_v57 }
  0xae   :  { %507 = vmatpush2.msra.mxu0 %v282_v58 }
  0xaf   :  { %508 = vmatprep.subr.mxu0 %v281_v59 }
  0xb0   :  { %509 = vmatpush2.msra.mxu0 %v280_v60 }
  0xb1   :  { %510 = vmatprep.subr.mxu0 %v279_v61 }
  0xb2   :  { %511 = vmatpush2.msra.mxu0 %v278_v62 }
  0xb3   :  { %512 = vmatprep.subr.mxu0 %v277_v63 }
  0xb4   :  { %513 = vmatpush2.msra.mxu0 %v276_v0 }
  0xb5   :  { %514 = vmatprep.subr.mxu0 %v275_v1 }
  0xb6   :  { %515 = vmatpush2.msra.mxu0 %v274_v2 }
  0xb7   :  { %516 = vmatprep.subr.mxu0 %v273_v3 }
  0xb8   :  { %517 = vmatpush2.msra.mxu0 %v272_v4 }
  0xb9   :  { %518 = vmatprep.subr.mxu0 %v271_v5 }
  0xba   :  { %519 = vmatpush2.msra.mxu0 %v270_v6  ;;  %v729_v6 = vld [vmem:[#allocation8 + $0x78] sm:$0xff] }
  0xbb   :  { %520 = vmatprep.subr.mxu0 %v269_v7  ;;  %v728_v7 = vld [vmem:[#allocation8 + $0x70] sm:$0xff] }
  0xbc   :  { %521 = vmatpush2.msra.mxu0 %v268_v8  ;;  %v727_v8 = vld [vmem:[#allocation8 + $0x68] sm:$0xff] }
  0xbd   :  { %522 = vmatprep.subr.mxu0 %v267_v9  ;;  %v726_v9 = vld [vmem:[#allocation8 + $0x60] sm:$0xff] }
  0xbe   :  { %523 = vmatpush2.msra.mxu0 %v266_v10  ;;  %v725_v10 = vld [vmem:[#allocation8 + $0x58] sm:$0xff] }
  0xbf   :  { %525 = vmatmul.mubr.f32.vlgmr.msra.gmra.mxu0 %v103_v11  ;;  %1028 = vmatprep.subr.mxu0 %v1212_v22  ;;  %v724_v11 = vld [vmem:[#allocation8 + $0x50] sm:$0xff] }
  0xc0   :  { %1060 = vmatprep.mubr.msk.f32.mxu0 %vm1213_vm1, %v1212_v22  ;;  %1029 = vmatpush3.msra.mxu0 %v823_v23 }
  0xc1   :  { %1030 = vmatprep.subr.mxu0 %v1212_v22 }
  0xc2   :  { %1031 = vmatpush3.msra.mxu0 %v822_v24 }
  0xc3   :  { %1032 = vmatprep.subr.mxu0 %v1212_v22 }
  0xc4   :  { %1033 = vmatpush3.msra.mxu0 %v821_v25 }
  0xc5   :  { %1034 = vmatprep.subr.mxu0 %v1212_v22 }
  0xc6   :  { %1035 = vmatpush3.msra.mxu0 %v820_v26 }
  0xc7   :  { %1036 = vmatprep.subr.mxu0 %v1212_v22 }
  0xc8   :  { %1037 = vmatpush3.msra.mxu0 %v819_v27 }
  0xc9   :  { %1038 = vmatprep.subr.mxu0 %v1212_v22 }
  0xca   :  { %1039 = vmatpush3.msra.mxu0 %v818_v28 }
  0xcb   :  { %1040 = vmatprep.subr.mxu0 %v1212_v22 }
  0xcc   :  { %1041 = vmatpush3.msra.mxu0 %v817_v29 }
  0xcd   :  { %1042 = vmatprep.subr.mxu0 %v1212_v22 }
  0xce   :  { %1043 = vmatpush3.msra.mxu0 %v816_v30 }
  0xcf   :  { %1044 = vmatprep.subr.mxu0 %v1212_v22 }
  0xd0   :  { %1045 = vmatpush3.msra.mxu0 %v815_v31 }
  0xd1   :  { %1046 = vmatprep.subr.mxu0 %v1212_v22 }
  0xd2   :  { %1047 = vmatpush3.msra.mxu0 %v814_v32 }
  0xd3   :  { %1048 = vmatprep.subr.mxu0 %v1212_v22 }
  0xd4   :  { %1049 = vmatpush3.msra.mxu0 %v813_v33 }
  0xd5   :  { %1050 = vmatprep.subr.mxu0 %v1212_v22 }
  0xd6   :  { %1051 = vmatpush3.msra.mxu0 %v812_v34 }
  0xd7   :  { %1052 = vmatprep.subr.mxu0 %v1212_v22 }
  0xd8   :  { %1053 = vmatpush3.msra.mxu0 %v811_v35 }
  0xd9   :  { %1054 = vmatprep.subr.mxu0 %v1212_v22 }
  0xda   :  { %1055 = vmatpush3.msra.mxu0 %v810_v42 }
  0xdb   :  { %1056 = vmatprep.subr.mxu0 %v1212_v22 }
  0xdc   :  { %1057 = vmatpush3.msra.mxu0 %v809_v43 }
  0xdd   :  { %1058 = vmatprep.subr.mxu0 %v1212_v22 }
  0xde   :  { %1059 = vmatpush3.msra.mxu0 %v808_v44 }
 0x13e   :  { %v384_v50 = vpop.f32.mrf.mxu0 }
 0x13f   :  { %v385_v55 = vadd.f32 %v384_v50, %v307_v51  ;;  %v923_v50 = vld [vmem:[%s1347_s8] ss:$0 sm:$0xff] }
 0x140   :  { %v386_v53 = vpop.f32.mrf.mxu0 }
 0x141   :  { %v455_v54 = vpop.f32.mrf.mxu1  ;;  %v387_v56 = vadd.f32 %v386_v53, %v311_v52 }
 0x142   :  { %v456_v58 = vadd.f32 %v455_v54, %v385_v55 }
 0x143   :  { %v457_v57 = vpop.f32.mrf.mxu1 }
 0x144   :  { %v458_v61 = vadd.f32 %v457_v57, %v387_v56 }
 0x148   :  { %v597_v60 = vpop.f32.mrf.mxu1 }
 0x14a   :  { %v599_v2 = vpop.f32.mrf.mxu1 }
 0x17f   :  { %v526_v59 = vpop.f32.mrf.mxu0 }
 0x180   :  { %v527_v62 = vadd.f32 %v526_v59, %v456_v58 }
 0x181   :  { %v528_v63 = vpop.f32.mrf.mxu0 }
 0x182   :  { %v529_v0 = vadd.f32 %v528_v63, %v458_v61  ;;  %v598_v1 = vadd.f32 %v597_v60, %v527_v62 }
 0x184   :  { %v600_v3 = vadd.f32 %v599_v2, %v529_v0  ;;  %v602_v5 = vmax.f32 %v598_v1, 0.0 }
 0x186   :  { %v603_v4 = vmax.f32 %v600_v3, 0.0 }
 0x188   :  { %707 = vmatprep.mubr.f32.mxu1 %v603_v4 }
 0x189   :  { %708 = vmatmul.mubr.f32.vlgmr.msra.gmra.mxu1 %v602_v5 }
 0x18a   :  { %994 = vmatpush3.msra.mxu1 %v729_v6  ;;  %1025 = vmatprep.mubr.msk.f32.mxu1 %vm1213_vm1, %v1212_v22 }
 0x18b   :  { %995 = vmatprep.subr.mxu1 %v1212_v22 }
 0x18c   :  { %996 = vmatpush3.msra.mxu1 %v728_v7 }
 0x18d   :  { %997 = vmatprep.subr.mxu1 %v1212_v22 }
 0x18e   :  { %998 = vmatpush3.msra.mxu1 %v727_v8 }
 0x18f   :  { %999 = vmatprep.subr.mxu1 %v1212_v22 }
 0x190   :  { %1000 = vmatpush3.msra.mxu1 %v726_v9 }
 0x191   :  { %1001 = vmatprep.subr.mxu1 %v1212_v22 }
 0x192   :  { %1002 = vmatpush3.msra.mxu1 %v725_v10 }
 0x193   :  { %1003 = vmatprep.subr.mxu1 %v1212_v22 }
 0x194   :  { %1004 = vmatpush3.msra.mxu1 %v724_v11 }
 0x195   :  { %1005 = vmatprep.subr.mxu1 %v1212_v22 }
 0x196   :  { %1006 = vmatpush3.msra.mxu1 %v723_v12 }
 0x197   :  { %1007 = vmatprep.subr.mxu1 %v1212_v22 }
 0x198   :  { %1008 = vmatpush3.msra.mxu1 %v722_v13 }
 0x199   :  { %1009 = vmatprep.subr.mxu1 %v1212_v22 }
 0x19a   :  { %1010 = vmatpush3.msra.mxu1 %v721_v14 }
 0x19b   :  { %1011 = vmatprep.subr.mxu1 %v1212_v22 }
 0x19c   :  { %1012 = vmatpush3.msra.mxu1 %v720_v15 }
 0x19d   :  { %1013 = vmatprep.subr.mxu1 %v1212_v22 }
 0x19e   :  { %1014 = vmatpush3.msra.mxu1 %v719_v16 }
 0x19f   :  { %1015 = vmatprep.subr.mxu1 %v1212_v22 }
 0x1a0   :  { %1016 = vmatpush3.msra.mxu1 %v718_v17 }
 0x1a1   :  { %1017 = vmatprep.subr.mxu1 %v1212_v22 }
 0x1a2   :  { %1018 = vmatpush3.msra.mxu1 %v717_v18 }
 0x1a3   :  { %1019 = vmatprep.subr.mxu1 %v1212_v22 }
 0x1a4   :  { %1020 = vmatpush3.msra.mxu1 %v716_v19 }
 0x1a5   :  { %1021 = vmatprep.subr.mxu1 %v1212_v22 }
 0x1a6   :  { %1022 = vmatpush3.msra.mxu1 %v715_v20 }
 0x1a7   :  { %1023 = vmatprep.subr.mxu1 %v1212_v22 }
 0x1a8   :  { %1024 = vmatpush3.msra.mxu1 %v714_v21 }
 0x249   :  { %v956_v36 = vpop.f32.mrf.mxu1 }
 0x24b   :  { %v957_v38 = vpop.f32.mrf.mxu1 }
 0x24c   :  { %v958_v39 = vadd.f32 %v957_v38, %v956_v36 }
 0x24e   :  { %v710_v40 = vadd.f32 %v958_v39, %v921_v37 }
 0x250   :  { %v713_v41 = vmax.f32 %v710_v40, 0.0 }
 0x252   :  { %1026 = vmatmul.mubr.f32.vlgmr.msra.gmra.mxu1 %v713_v41 }
 0x312   :  { %v803_v46 = vpop.f32.mrf.mxu1 }
 0x313   :  { %v804_v47 = vadd.f32 %v922_v45, %v803_v46 }
 0x314   :  { %v1027_v48 = vpop.f32.mrf.mxu1 }
 0x315   :  { %v807_v49 = vmax.f32 %v804_v47, 0.0 }
 0x317   :  { %1061 = vmatmul.mubr.f32.vlgmr.msra.gmra.mxu0 %v807_v49 }
 0x3d7   :  { %v897_v51 = vpop.f32.mrf.mxu0 }
 0x3d8   :  { %v898_v22 = vadd.f32 %v923_v50, %v897_v51 }
 0x3d9   :  { %v1062_v52 = vpop.f32.mrf.mxu0 }
 0x3da   :  { %902 = vst.msk [vmem:[#allocation11] sm:$0xff] %vm901_vm2, %v898_v22 }
 0x3db   :  { %1186 = shalt.err (!%p1183_p1)
}
 0x3dc   :  { %912 = dma.vmem_to_hbm [thread:$0]  %s910_s19, 128, %s1348_s9, [#allocation4]  }
 0x3dd   :  { %1201 = dma.done.wait [#allocation4], 128  }
 0x3de   :  { %1202 = vsyncadd [#allocation4], 4294967168 }
 0x3df   :  { %916 = vsyncpa [#allocation3], 1 }
 0x3e0   :  { %917 = vsyncpa [#allocation6], 1 }
 0x3e1   :  { %918 = vsyncpa [#allocation9], 1 }
 0x3e2   :  { %919 = vsyncpa [#allocation4], 1 }

</bundles_post_ra>
